<compile_context>
chip_gen: v6e
topology: v6e:2x2x1
jax: 0.10.0
libtpu: 0.0.40
codegen_flags: <defaults>
</compile_context>

<pallas_src>
import jax
import jax.numpy as jnp
from jax.experimental import pallas as pl
from jax.experimental.pallas import tpu as pltpu

_LANE = 128
_SUBLANE = 8
# Per-call VMEM budget that is safe on all listed generations
# (v5e 16 MiB scoped default, v6e 32/128 MiB, v7x 32/64 MiB).
_VMEM_BUDGET_BYTES = 40 * 1024 * 1024


def _round_up(x, m):
    return (x + m - 1) // m * m


def _linear_kernel(x_ref, wt_ref, b_ref, o_ref):
    # x_ref : (TM, n_in)       VMEM
    # wt_ref: (n_in, n_out_p)  VMEM  (pre-transposed, padded -> lane-dense)
    # b_ref : (1, n_out_p)     VMEM
    # o_ref : (TM, n_out_p)    VMEM  (n_out_p % 128 == 0 -> unmasked stores)
    acc = jnp.dot(x_ref[...], wt_ref[...], preferred_element_type=jnp.float32)
    o_ref[...] = (acc + b_ref[...]).astype(o_ref.dtype)


def _pipeline_vmem_bytes(block_b, n_in, n_out_p, x_isz, w_isz, o_isz):
    # Double-buffered streamed x/out tiles + resident (replicated) weight/bias.
    return (2 * block_b * n_in * x_isz
            + 2 * block_b * n_out_p * o_isz
            + n_in * n_out_p * w_isz
            + n_out_p * w_isz)


def mininet_forward(x, weight, bias, *, block_b=4096, compute_dtype=None):
    """mininet forward: x @ W.T + b (PyTorch nn.Linear semantics).

    x: (B, n_input); weight: (n_output, n_input); bias: (n_output,).
    compute_dtype: optional narrower dtype (e.g. jnp.bfloat16) for the
      streamed operands; accumulation stays f32, output keeps x's dtype.
    """
    B, n_in = x.shape
    n_out, n_in_w = weight.shape
    assert n_in == n_in_w, "weight shape mismatch"
    out_dtype = x.dtype

    # One-time (tiny) wrapper-side prep: lane-dense padded, transposed weight.
    n_out_p = _round_up(max(n_out, _LANE), _LANE)
    wt = jnp.pad(weight.T, ((0, 0), (0, n_out_p - n_out)))        # (n_in, n_out_p)
    b2 = jnp.pad(bias, (0, n_out_p - n_out)).reshape(1, n_out_p)  # (1, n_out_p)

    if compute_dtype is not None:
        x = x.astype(compute_dtype)
        wt = wt.astype(compute_dtype)

    x_isz = jnp.dtype(x.dtype).itemsize
    w_isz = jnp.dtype(wt.dtype).itemsize
    o_isz = jnp.dtype(out_dtype).itemsize

    # Cap the batch tile so double-buffered tiles + resident weight fit the
    # generation-safe VMEM budget (keeps 2-deep pipelining everywhere).
    block_b = min(block_b, _round_up(B, _SUBLANE))
    block_b = max(_SUBLANE, _round_up(block_b, _SUBLANE))
    while (block_b > _SUBLANE and
           _pipeline_vmem_bytes(block_b, n_in, n_out_p, x_isz, w_isz, o_isz)
           > _VMEM_BUDGET_BYTES):
        block_b = max(_SUBLANE, _round_up(block_b // 2, _SUBLANE))

    vmem_need = _pipeline_vmem_bytes(block_b, n_in, n_out_p, x_isz, w_isz, o_isz)
    vmem_limit = int(min(max(2 * vmem_need, 8 << 20), 60 << 20))

    out_shape = jax.ShapeDtypeStruct((B, n_out_p), out_dtype)

    if B <= block_b:
        # Gridless single invocation: everything resident in VMEM; at small B
        # the launch + HBM<->VMEM round trip dominates, so skip grid plumbing.
        # TODO(synk): at B~8 a fused jnp.dot inside the surrounding jit (or
        # fusing the neighboring elementwise ops into this kernel) beats a
        # standalone custom call; kept as a kernel per the exercise.
        out_p = pl.pallas_call(
            _linear_kernel,
            out_shape=out_shape,
            in_specs=[
                pl.BlockSpec(memory_space=pltpu.MemorySpace.VMEM),
                pl.BlockSpec(memory_space=pltpu.MemorySpace.VMEM),
                pl.BlockSpec(memory_space=pltpu.MemorySpace.VMEM),
            ],
            out_specs=pl.BlockSpec(memory_space=pltpu.MemorySpace.VMEM),
            compiler_params=pltpu.CompilerParams(vmem_limit_bytes=vmem_limit),
        )(x, wt, b2)
    else:
        # Large batch: 1-D parallel grid over big batch tiles; weight/bias are
        # grid-invariant (resident), x/out tiles stream with double-buffering.
        grid = (pl.cdiv(B, block_b),)
        out_p = pl.pallas_call(
            _linear_kernel,
            out_shape=out_shape,
            grid_spec=pltpu.PrefetchScalarGridSpec(
                num_scalar_prefetch=0,
                grid=grid,
                in_specs=[
                    pl.BlockSpec((block_b, n_in), lambda i: (i, 0)),
                    pl.BlockSpec((n_in, n_out_p), lambda i: (0, 0)),
                    pl.BlockSpec((1, n_out_p), lambda i: (0, 0)),
                ],
                out_specs=pl.BlockSpec((block_b, n_out_p), lambda i: (i, 0)),
            ),
            compiler_params=pltpu.CompilerParams(
                dimension_semantics=("parallel",),
                vmem_limit_bytes=vmem_limit,
            ),
        )(x, wt, b2)

    # Drop the lane-density padding columns.
    return out_p[:, :n_out]


if __name__ == "__main__":
    # Small shapes consistent with the module: batch=8, n_input=32, n_output=64
    B, N_IN, N_OUT = 8, 32, 64

    key = jax.random.PRNGKey(0)
    kx, kw, kb = jax.random.split(key, 3)

    # Deterministic synthetic parameters (mimic nn.Linear's uniform init range)
    bound = 1.0 / jnp.sqrt(jnp.float32(N_IN))
    weight = jax.random.uniform(kw, (N_OUT, N_IN), jnp.float32, -bound, bound)
    bias = jax.random.uniform(kb, (N_OUT,), jnp.float32, -bound, bound)
    x = jax.random.normal(kx, (B, N_IN), jnp.float32)

    # Small-batch (gridless) path, exact f32 numerics.
    out = jax.block_until_ready(mininet_forward(x, weight, bias))
    ref = x @ weight.T + bias
    assert out.shape == (B, N_OUT)
    assert jnp.allclose(out, ref, atol=1e-5, rtol=1e-5)

    # Tiled large-batch path: 4096-row tiles -> 4 even grid steps (v7x gets
    # two balanced, non-trivial steps per TensorCore), lane-dense output.
    B2 = 16384
    x2 = jax.random.normal(jax.random.PRNGKey(1), (B2, N_IN), jnp.float32)
    out2 = jax.block_until_ready(mininet_forward(x2, weight, bias))
    ref2 = x2 @ weight.T + bias
    assert out2.shape == (B2, N_OUT)
    assert jnp.allclose(out2, ref2, atol=1e-5, rtol=1e-5)

    # Optional bf16 streamed operands (halves HBM traffic), f32 accumulation
    # and f32 output; relaxed tolerance because input rounding changes numerics.
    out3 = jax.block_until_ready(
        mininet_forward(x2, weight, bias, compute_dtype=jnp.bfloat16))
    assert out3.shape == (B2, N_OUT)
    assert jnp.allclose(out3, ref2, atol=5e-2, rtol=5e-2)

    print("KERNEL_OK")
</pallas_src>

<mosaic_0001>
module attributes {stable_mosaic.version = 11 : i64} {
  func.func @_linear_kernel(%arg0: memref<8x32xf32, #tpu.memory_space<vmem>>, %arg1: memref<32x128xf32, #tpu.memory_space<vmem>>, %arg2: memref<1x128xf32, #tpu.memory_space<vmem>>, %arg3: memref<8x128xf32, #tpu.memory_space<vmem>>) attributes {dimension_semantics = [], scalar_prefetch = 0 : i64, scratch_operands = 0 : i64, tpu.core_type = #tpu.core_type<tc>} {
    %c0 = arith.constant 0 : index
    %c0_0 = arith.constant 0 : index
    %0 = vector.load %arg0[%c0, %c0_0] : memref<8x32xf32, #tpu.memory_space<vmem>>, vector<8x32xf32>
    %c0_1 = arith.constant 0 : index
    %c0_2 = arith.constant 0 : index
    %1 = vector.load %arg1[%c0_1, %c0_2] : memref<32x128xf32, #tpu.memory_space<vmem>>, vector<32x128xf32>
    %cst = arith.constant dense<0.000000e+00> : vector<8x128xf32>
    %2 = tpu.matmul %0, %1, %cst {dimension_numbers = #tpu.dot_dimension_numbers<[1], [0], [0], [1], [0, 0, 1, 1], [], []>} : vector<8x32xf32>, vector<32x128xf32>, vector<8x128xf32> -> vector<8x128xf32>
    %c0_3 = arith.constant 0 : index
    %c0_4 = arith.constant 0 : index
    %3 = vector.load %arg2[%c0_3, %c0_4] : memref<1x128xf32, #tpu.memory_space<vmem>>, vector<1x128xf32>
    %4 = vector.broadcast %3 : vector<1x128xf32> to vector<8x128xf32>
    %5 = arith.addf %2, %4 : vector<8x128xf32>
    %c0_5 = arith.constant 0 : index
    %c0_6 = arith.constant 0 : index
    %6 = vector.load %arg3[%c0_5, %c0_6] : memref<8x128xf32, #tpu.memory_space<vmem>>, vector<8x128xf32>
    tpu.vector_store %arg3[%c0_5, %c0_6], %5 {strides = array<i32>} : memref<8x128xf32, #tpu.memory_space<vmem>>, vector<8x128xf32>,
    return
  }
}

</mosaic_0001>

<bundles_post_ra>
// kernel: tpu_custom_call.1
= control target key start
LH: loop header
LB: loop body
LE: loop exit
PB: predicated region body
PF: predicated region fallthrough
CT: control target
= control target key end

     0   :  { %8 = vsyncpa [#allocation3], 0  ;;  %s274_s0 = inlined_call_operand.hbm [shape: f32[8,32], index: 0, kind: input, shape index: {}]   ;;  %s275_s1 = inlined_call_operand.hbm [shape: f32[32,128], index: 1, kind: input, shape index: {}]   ;;  %s276_s2 = inlined_call_operand.vmem [shape: f32[1,128], index: 2, kind: input, shape index: {}]   ;;  %s277_s3 = inlined_call_operand.hbm [shape: f32[8,128], index: 3, kind: output, shape index: {}]  }
   0x1   :  { %9 = vsyncpa [#allocation6], 0 }
   0x2   :  { %10 = vsyncpa [#allocation4], 0  ;;  %s235_s12 = smov [#allocation2]   ;;  %s236_s14 = smov [#allocation5]  }
   0x3   :  { %s17_s13 = sshll.u32 %s235_s12, 4  ;;  %s26_s15 = sshll.u32 %s236_s14, 4  ;;  %s18_s13 = int_to_ptr.vmem [resolvable:$true] %s17_s13  ;;  %s27_s15 = int_to_ptr.vmem [resolvable:$true] %s26_s15 }
   0x4   :  { %s177_s16 = scalar_lea.vmem %s18_s13, 128  ;;  %p182_p1 = scmp.lt.s32.totalorder %s18_s13, %s18_s13 }
   0x5   :  { %p178_p0 = scmp.ne.s32.totalorder %s18_s13, %s177_s16  ;;  %p183_p2 = scmp.lt.s32.totalorder %s177_s16, %s177_s16 }
   0x7   :  { %p184_p3 = por %p183_p2, %p182_p1 }
   0x9   :  { %p185_p4 = pnand %p184_p3, %p178_p0 }
   0xb   :  { %188 = shalt.err (!%p185_p4)
}
   0xc   :  { %20 = dma.hbm_to_vmem [thread:$0]  %s274_s0, 128, %s18_s13, [#allocation3]  }
   0xd   :  { %s197_s19 = scalar_lea.vmem %s27_s15, 512  ;;  %p202_p6 = scmp.lt.s32.totalorder %s27_s15, %s27_s15 }
   0xe   :  { %p198_p5 = scmp.ne.s32.totalorder %s27_s15, %s197_s19  ;;  %p203_p7 = scmp.lt.s32.totalorder %s197_s19, %s197_s19 }
  0x10   :  { %p204_p8 = por %p203_p7, %p202_p6 }
  0x12   :  { %p205_p9 = pnand %p204_p8, %p198_p5 }
  0x14   :  { %208 = shalt.err (!%p205_p9)
}
  0x15   :  { %s237_s20 = smov 128   ;;  %s238_s21 = smov 8  }
  0x16   :  { %32 = dma.hbm_to_vmem [thread:$0]  %s275_s1, 512, %s27_s15, [#allocation6], %s237_s20, %s237_s20, %s238_s21  }
  0x17   :  { %229 = dma.done.wait [#allocation3], 128  }
  0x18   :  { %230 = vsyncadd [#allocation3], 4294967168 }
  0x19   :  { %231 = dma.done.wait [#allocation6], 512  }
  0x1a   :  { %232 = vsyncadd [#allocation6], 4294966784  ;;  %v239_v0 = vmov 0.0   ;;  %vm240_vm0 = vmmov 0   ;;  %v45_v1 = vld [vmem:[#allocation5 + $0x18] sm:$0xff]  ;;  %v44_v2 = vld [vmem:[#allocation5 + $0x10] sm:$0xff] }
  0x1b   :  { %151 = vmatprep.subr.mxu0 %v239_v0  ;;  %159 = vmatprep.mubr.msk.f32.mxu0 %vm240_vm0, %v239_v0  ;;  %v43_v3 = vld [vmem:[#allocation5 + $0x8] sm:$0xff]  ;;  %v42_v4 = vld [vmem:[#allocation5] sm:$0xff]  ;;  %v41_v5 = vld [vmem:[#allocation2] sm:$0xff]  ;;  %vm53_vm1 = vcmask 261120   ;;  %s241_s24 = smov [#allocation7]  }
  0x1c   :  { %152 = vmatpush3.msra.mxu0 %v45_v1  ;;  %v144_v6 = vld [vmem:[%s276_s2] ss:$0 sm:$0xff]  ;;  %s134_s25 = sshll.u32 %s241_s24, 4  ;;  %s135_s25 = int_to_ptr.vmem [resolvable:$true] %s134_s25 }
  0x1d   :  { %153 = vmatprep.subr.mxu0 %v239_v0  ;;  %s209_s26 = scalar_lea.vmem %s135_s25, 128  ;;  %p214_p11 = scmp.lt.s32.totalorder %s135_s25, %s135_s25 }
  0x1e   :  { %154 = vmatpush3.msra.mxu0 %v44_v2  ;;  %p210_p10 = scmp.ne.s32.totalorder %s135_s25, %s209_s26  ;;  %p215_p12 = scmp.lt.s32.totalorder %s209_s26, %s209_s26 }
  0x1f   :  { %155 = vmatprep.subr.mxu0 %v239_v0 }
  0x20   :  { %156 = vmatpush3.msra.mxu0 %v43_v3  ;;  %p216_p13 = por %p215_p12, %p214_p11 }
  0x21   :  { %157 = vmatprep.subr.mxu0 %v239_v0 }
  0x22   :  { %158 = vmatpush3.msra.mxu0 %v42_v4  ;;  %p217_p0 = pnand %p216_p13, %p210_p10 }
  0x23   :  { %160 = vmatmul.mubr.msk.f32.vlgmr.msra.gmra.mxu0 %vm53_vm1, %v41_v5 }
  0xe3   :  { %v123_v7 = vpop.f32.mrf.mxu0 }
  0xe4   :  { %v124_v8 = vadd.f32 %v144_v6, %v123_v7 }
  0xe5   :  { %v161_v9 = vpop.f32.mrf.mxu0 }
  0xe6   :  { %127 = vst [vmem:[#allocation7] sm:$0xff] %v124_v8 }
  0xe7   :  { %220 = shalt.err (!%p217_p0)
}
  0xe8   :  { %137 = dma.vmem_to_hbm [thread:$0]  %s135_s25, 128, %s277_s3, [#allocation4]  }
  0xe9   :  { %233 = dma.done.wait [#allocation4], 128  }
  0xea   :  { %234 = vsyncadd [#allocation4], 4294967168 }
  0xeb   :  { %141 = vsyncpa [#allocation3], 1 }
  0xec   :  { %142 = vsyncpa [#allocation6], 1 }
  0xed   :  { %143 = vsyncpa [#allocation4], 1 }

</bundles_post_ra>
